<compile_context>
chip_gen: v7x
topology: tpu7x:2x2x1
jax: 0.10.0
libtpu: 0.0.40
codegen_flags: <defaults>
</compile_context>

<pallas_src>
import functools

import jax
import jax.numpy as jnp
from jax.experimental import pallas as pl
from jax.experimental.pallas import tpu as pltpu


# ----------------------------------------------------------------------------
# Pallas kernel: one tile of rows -> per-group accumulated loss / histograms
# ----------------------------------------------------------------------------
def _ghm_kernel(logits_ref, mask_ref, tgt_ref, cema_ref, gdema_ref,
                lsum_ref, tmsum_ref, chist_ref, gdhist_ref,
                *, num_bins, label_smoothing):
    t = pl.program_id(1)              # tile index inside this group (reduction)

    @pl.when(t == 0)
    def _init():
        lsum_ref[...] = jnp.zeros_like(lsum_ref)
        tmsum_ref[...] = jnp.zeros_like(tmsum_ref)
        chist_ref[...] = jnp.zeros_like(chist_ref)
        gdhist_ref[...] = jnp.zeros_like(gdhist_ref)

    TN, C = logits_ref.shape
    MC = mask_ref.shape[-1]           # 1 (per-token mask) or C (per-class mask)

    logits = logits_ref[...].astype(jnp.float32)       # (TN, C)
    mask = mask_ref[...].astype(jnp.float32)           # (TN, MC) raw mask values
    tgt = tgt_ref[...]                                  # (TN, 1) int32

    mask_nz = (mask != 0.0).astype(jnp.float32)         # logical mask
    if MC == 1:
        time_mask = mask_nz                              # (TN, 1)
    else:
        time_mask = (jnp.sum(mask_nz, axis=1, keepdims=True) > 0.0
                     ).astype(jnp.float32)               # (TN, 1)

    # one-hot(target) via lane iota compare
    class_iota = jax.lax.broadcasted_iota(jnp.int32, (TN, C), 1)
    onehot = (class_iota == tgt).astype(jnp.float32)     # (TN, C)

    # masked log-softmax pieces (single full-width exp)
    logits_m = logits - 1.0e9 * (1.0 - mask_nz)
    m = jnp.max(logits_m, axis=1, keepdims=True)
    z = logits_m - m
    lse = jnp.log(jnp.sum(jnp.exp(z), axis=1, keepdims=True))    # (TN, 1)

    # raw mask value at the target class
    if MC == 1:
        mask_t = mask                                     # (TN, 1)
    else:
        mask_t = jnp.sum(onehot * mask, axis=1, keepdims=True)

    # log-prob / prob at the target class (one exp per row, not per element)
    z_t = jnp.sum(onehot * z, axis=1, keepdims=True)      # (TN, 1)
    lp_t = z_t - lse
    p_t = jnp.exp(lp_t)

    ls = float(label_smoothing)
    if ls == 0.0:
        # target_prob = onehot * mask  ->  CE reduces to -mask_t * log_prob_t
        raw_loss = -mask_t * lp_t                          # (TN, 1)
        tp_t = mask_t
    else:
        lo, hi = ls, 1.0 - ls
        target_prob = jnp.clip(onehot, lo, hi) * mask      # (TN, C)
        log_probs = z - lse
        raw_loss = -jnp.sum(target_prob * log_probs, axis=1, keepdims=True)
        tp_t = min(max(1.0, lo), hi) * mask_t

    # GD = |softmax - target_prob| gathered at the target class
    GD = jnp.abs(p_t - tp_t)
    GD_index = jnp.clip(jnp.floor(GD * num_bins), 0, num_bins - 1).astype(jnp.int32)

    # weights = sqrt(class_ema[target] * GD_ema[bin]); gathers via one-hot dots.
    # NOTE: matches torch exactly (no epsilon) -- EMA entries are kept > 0 by
    # the update rule, so rsqrt stays finite in practice.
    class_w = jnp.sum(onehot * cema_ref[...], axis=1, keepdims=True)
    bin_iota = jax.lax.broadcasted_iota(jnp.int32, (TN, num_bins), 1)
    bin_onehot = (bin_iota == GD_index).astype(jnp.float32)
    gd_w = jnp.sum(bin_onehot * gdema_ref[...], axis=1, keepdims=True)

    loss_w = raw_loss * jax.lax.rsqrt(class_w * gd_w) * time_mask

    # per-group scalar partials (output blocks stay resident across this group)
    lsum_ref[...] += jnp.sum(loss_w, keepdims=True).reshape(1, 1, 1)
    tmsum_ref[...] += jnp.sum(time_mask, keepdims=True).reshape(1, 1, 1)

    # histograms on the (otherwise idle) MXU: column sums via ones-row matmul
    ones_row = jnp.ones((1, TN), jnp.float32)
    chist_ref[...] += jnp.dot(ones_row, onehot * time_mask,
                              preferred_element_type=jnp.float32).reshape(1, 1, C)
    gdhist_ref[...] += jnp.dot(ones_row, bin_onehot * time_mask,
                               preferred_element_type=jnp.float32
                               ).reshape(1, 1, num_bins)


# ----------------------------------------------------------------------------
# Wrapper: tiling, grouping, padding, pallas_call
# ----------------------------------------------------------------------------
def _round_up(x, m):
    return ((x + m - 1) // m) * m


def _pick_tile_n(n_rows, n_classes):
    # Keep the f32 working block around ~2 MiB so the double-buffered pipeline
    # plus in-kernel temporaries stay well below the scoped-VMEM limit on
    # every generation (incl. v7x's 64 MiB physical VMEM), while tiles stay
    # big enough to approach the HBM roofline.
    budget = 2 * 1024 * 1024
    t = budget // max(1, n_classes * 4)
    t = max(16, min(1024, (t // 16) * 16))
    t = min(t, _round_up(n_rows, 16))
    return max(16, t)


def ghm_forward(pred_logits, target_label, mask, class_ema, GD_ema,
                num_bins, label_smoothing=0.0, tile_n=None, num_groups=None):
    """Pallas forward. Returns (loss_scalar, class_hist (C,), GD_hist (num_bins,))."""
    assert pred_logits.ndim == 3
    B, T, C = pred_logits.shape
    assert target_label.shape == (B, T)
    N = B * T

    # Keep logits in their native dtype (e.g. bf16) -- upcast happens in-kernel.
    logits2 = pred_logits.reshape(N, C)
    tgt2 = target_label.reshape(N, 1).astype(jnp.int32)
    cema2 = class_ema.reshape(1, C).astype(jnp.float32)
    gdema2 = GD_ema.reshape(1, num_bins).astype(jnp.float32)

    # Per-token masks travel as (N, 1); only a genuinely per-class mask travels
    # at (N, C) width (avoids duplicating the logits' HBM traffic).
    if mask is None:
        mask2 = jnp.ones((N, 1), jnp.float32)
    else:
        if mask.ndim == 2:
            mask = mask[..., None]
        assert mask.shape[0] == B and mask.shape[1] == T
        assert mask.shape[-1] in (1, C)
        mask2 = mask.reshape(N, mask.shape[-1]).astype(jnp.float32)

    if tile_n is None:
        tile_n = _pick_tile_n(N, C)
    num_tiles = -(-N // tile_n)

    # Leading "parallel" group axis: lets megacore parts split the token axis
    # across TensorCores (per-group partials are reduced outside the kernel).
    if num_groups is None:
        num_groups = 2 if num_tiles >= 2 else 1
    G = num_groups
    tpg = -(-num_tiles // G)                    # tiles per group
    n_pad = G * tpg * tile_n
    if n_pad != N:
        pad = n_pad - N
        # Zero mask rows => time_mask == 0 => padded rows contribute nothing
        # (and produce no NaN/Inf anywhere).
        logits2 = jnp.pad(logits2, ((0, pad), (0, 0)))
        mask2 = jnp.pad(mask2, ((0, pad), (0, 0)))
        tgt2 = jnp.pad(tgt2, ((0, pad), (0, 0)))

    kernel = functools.partial(_ghm_kernel, num_bins=num_bins,
                               label_smoothing=float(label_smoothing))
    mc = mask2.shape[1]

    def row_block(g, t):
        return (g * tpg + t, 0)

    lsum, tmsum, chist, gdhist = pl.pallas_call(
        kernel,
        out_shape=(
            jax.ShapeDtypeStruct((G, 1, 1), jnp.float32),
            jax.ShapeDtypeStruct((G, 1, 1), jnp.float32),
            jax.ShapeDtypeStruct((G, 1, C), jnp.float32),
            jax.ShapeDtypeStruct((G, 1, num_bins), jnp.float32),
        ),
        grid_spec=pltpu.PrefetchScalarGridSpec(
            num_scalar_prefetch=0,
            grid=(G, tpg),
            in_specs=[
                pl.BlockSpec((tile_n, C), row_block),          # logits
                pl.BlockSpec((tile_n, mc), row_block),         # mask
                pl.BlockSpec((tile_n, 1), row_block),          # targets
                pl.BlockSpec((1, C), lambda g, t: (0, 0)),     # class EMA (resident)
                pl.BlockSpec((1, num_bins), lambda g, t: (0, 0)),  # GD EMA (resident)
            ],
            out_specs=(
                pl.BlockSpec((1, 1, 1), lambda g, t: (g, 0, 0)),
                pl.BlockSpec((1, 1, 1), lambda g, t: (g, 0, 0)),
                pl.BlockSpec((1, 1, C), lambda g, t: (g, 0, 0)),
                pl.BlockSpec((1, 1, num_bins), lambda g, t: (g, 0, 0)),
            ),
        ),
        compiler_params=pltpu.CompilerParams(
            dimension_semantics=("parallel", "arbitrary")),
    )(logits2, mask2, tgt2, cema2, gdema2)

    # Tiny cross-group reduction + final division (scalar work, done in XLA).
    loss = jnp.sum(lsum) / jnp.sum(tmsum)
    class_hist = jnp.sum(chist, axis=(0, 1))
    GD_hist = jnp.sum(gdhist, axis=(0, 1))
    return loss, class_hist, GD_hist


# ----------------------------------------------------------------------------
# EMA update (matches update_ema in the torch module) + module-style wrapper
# ----------------------------------------------------------------------------
def update_ema(ema, alpha, num_bins, hist):
    hist = hist / (jnp.sum(hist) + 1e-10) * num_bins
    ema = ema * alpha + (1 - alpha) * hist
    ema = ema / (jnp.sum(ema) + 1e-10) * num_bins
    return ema


def ghm_loss(pred_logits, target_label, class_ema, GD_ema, mask=None,
             valid=False, num_bins=10, alpha=1 - 1e-06, label_smoothing=0.0,
             tile_n=None):
    """Functional GHMLoss.forward. Returns (loss, new_class_ema, new_GD_ema)."""
    # TODO(synk): the torch early-return for an empty batch (len(pred_logits)<=0)
    # is a host-side check with no in-kernel equivalent; handle it in the caller.
    C = pred_logits.shape[-1]
    loss, class_hist, GD_hist = ghm_forward(
        pred_logits, target_label, mask, class_ema, GD_ema,
        num_bins=num_bins, label_smoothing=label_smoothing, tile_n=tile_n)
    if not valid:
        new_GD_ema = update_ema(GD_ema.astype(jnp.float32), alpha, num_bins, GD_hist)
        new_class_ema = update_ema(class_ema.astype(jnp.float32), alpha, C, class_hist)
    else:
        new_GD_ema = GD_ema
        new_class_ema = class_ema
    return loss, new_class_ema, new_GD_ema


# ----------------------------------------------------------------------------
# Pure-JAX reference (mirrors the torch forward) for validation
# ----------------------------------------------------------------------------
def _ref_ghm(pred_logits, target_label, class_ema, GD_ema, mask, num_bins, ls):
    B, T, C = pred_logits.shape
    if mask is None:
        mask = jnp.ones((B, T, C), jnp.float32)
    if mask.ndim == 2:
        mask = mask[..., None]
    maskf = mask.astype(jnp.float32)
    mask_nz = (maskf != 0).astype(jnp.float32)
    time_mask = (jnp.sum(mask_nz, axis=-1) > 0).astype(jnp.float32)
    logits = pred_logits.astype(jnp.float32) - 1.0e9 * (1.0 - mask_nz)
    onehot = jax.nn.one_hot(target_label, C, dtype=jnp.float32)
    target_prob = jnp.clip(onehot, ls, 1.0 - ls) * maskf
    log_probs = jax.nn.log_softmax(logits, axis=-1)
    raw_loss = -jnp.sum(target_prob * log_probs, axis=-1)
    pred_probs = jax.nn.softmax(logits, axis=-1)
    GD = jnp.take_along_axis(jnp.abs(pred_probs - target_prob),
                             target_label[..., None], axis=-1)[..., 0]
    GD_index = jnp.clip(jnp.floor(GD * num_bins).astype(jnp.int32), 0, num_bins - 1)
    weights = jnp.sqrt(class_ema[target_label] * GD_ema[GD_index])
    lw = raw_loss / weights * time_mask
    loss = jnp.sum(lw) / jnp.sum(time_mask)
    class_hist = jnp.sum(jax.nn.one_hot(target_label, C, dtype=jnp.float32)
                         * time_mask[..., None], axis=(0, 1))
    GD_hist = jnp.sum(jax.nn.one_hot(GD_index, num_bins, dtype=jnp.float32)
                      * time_mask[..., None], axis=(0, 1))
    return loss, class_hist, GD_hist


if __name__ == "__main__":
    num_bins = 10
    key = jax.random.PRNGKey(0)

    def check(name, pred_logits, target_label, mask, class_ema, GD_ema, ls,
              tile_n=None):
        loss, chist, gdhist = ghm_forward(
            pred_logits, target_label, mask, class_ema, GD_ema,
            num_bins=num_bins, label_smoothing=ls, tile_n=tile_n)
        loss = jax.block_until_ready(loss)
        ref_loss, ref_chist, ref_gdhist = _ref_ghm(
            pred_logits, target_label, class_ema, GD_ema, mask, num_bins, ls)
        assert jnp.allclose(loss, ref_loss, rtol=1e-4, atol=1e-5), \
            (name, loss, ref_loss)
        assert jnp.allclose(chist, ref_chist, atol=1e-3), (name, chist, ref_chist)
        assert jnp.allclose(gdhist, ref_gdhist, atol=1e-3), (name, gdhist, ref_gdhist)

    # --- case 1: single tile, no mask, ls = 0, f32 logits ---------------------
    B, T, C = 2, 8, 16
    k1, k2, key = jax.random.split(key, 3)
    logits = jax.random.normal(k1, (B, T, C), jnp.float32)
    labels = jax.random.randint(k2, (B, T), 0, C, jnp.int32)
    class_ema = 0.5 + jnp.arange(C, dtype=jnp.float32) / C
    GD_ema = jnp.ones((num_bins,), jnp.float32)
    check("unmasked_f32", logits, labels, None, class_ema, GD_ema, 0.0)

    # --- case 2: multi-tile / multi-group grid + padding, per-token mask ------
    B, T, C = 2, 37, 16
    k1, k2, k3, key = jax.random.split(key, 4)
    logits = jax.random.normal(k1, (B, T, C), jnp.float32)
    labels = jax.random.randint(k2, (B, T), 0, C, jnp.int32)
    mask_tok = (jax.random.uniform(k3, (B, T)) > 0.3).astype(jnp.float32)
    check("masked_multitile", logits, labels, mask_tok, class_ema, GD_ema, 0.0,
          tile_n=16)

    # --- case 3: bf16 logits, per-class mask, label smoothing -----------------
    k1, k2, k3, key = jax.random.split(key, 4)
    logits_bf16 = jax.random.normal(k1, (B, T, C), jnp.float32).astype(jnp.bfloat16)
    labels3 = jax.random.randint(k2, (B, T), 0, C, jnp.int32)
    mask_cls = (jax.random.uniform(k3, (B, T, C)) > 0.2).astype(jnp.float32)
    check("per_class_bf16_ls", logits_bf16, labels3, mask_cls, class_ema, GD_ema,
          0.1, tile_n=16)

    # full module-style call (EMA update path), mirroring GHMLoss.forward
    loss, new_class_ema, new_GD_ema = ghm_loss(
        logits, labels, jnp.ones((C,), jnp.float32),
        jnp.ones((num_bins,), jnp.float32), mask=None, valid=False,
        num_bins=num_bins, alpha=1 - 1e-06, label_smoothing=0.0)
    jax.block_until_ready((loss, new_class_ema, new_GD_ema))

    print("KERNEL_OK")
</pallas_src>

<mosaic_0001>
module attributes {stable_mosaic.version = 11 : i64} {
  func.func @_ghm_kernel(%arg0: i32, %arg1: i32, %arg2: memref<16x16xf32, #tpu.memory_space<vmem>>, %arg3: memref<16x1xf32, #tpu.memory_space<vmem>>, %arg4: memref<16x1xi32, #tpu.memory_space<vmem>>, %arg5: memref<1x16xf32, #tpu.memory_space<vmem>>, %arg6: memref<1x10xf32, #tpu.memory_space<vmem>>, %arg7: memref<1x1x1xf32, #tpu.memory_space<vmem>>, %arg8: memref<1x1x1xf32, #tpu.memory_space<vmem>>, %arg9: memref<1x1x16xf32, #tpu.memory_space<vmem>>, %arg10: memref<1x1x10xf32, #tpu.memory_space<vmem>>) attributes {dimension_semantics = [#tpu.dimension_semantics<parallel>, #tpu.dimension_semantics<arbitrary>], iteration_bounds = array<i64: 1, 1>, scalar_prefetch = 0 : i64, scratch_operands = 0 : i64, tpu.core_type = #tpu.core_type<tc>, window_params = [{transform_indices = @transform_0, window_bounds = array<i64: 16, 16>}, {transform_indices = @transform_1, window_bounds = array<i64: 16, 1>}, {transform_indices = @transform_2, window_bounds = array<i64: 16, 1>}, {pipeline_mode = #tpu.pipeline_mode<synchronous>, transform_indices = @transform_3, window_bounds = array<i64: 1, 16>}, {pipeline_mode = #tpu.pipeline_mode<synchronous>, transform_indices = @transform_4, window_bounds = array<i64: 1, 10>}, {transform_indices = @transform_5, window_bounds = array<i64: 1, 1, 1>}, {transform_indices = @transform_6, window_bounds = array<i64: 1, 1, 1>}, {transform_indices = @transform_7, window_bounds = array<i64: 1, 1, 16>}, {transform_indices = @transform_8, window_bounds = array<i64: 1, 1, 10>}]} {
    %c0_i32 = arith.constant 0 : i32
    %0 = arith.cmpi eq, %arg1, %c0_i32 : i32
    %1 = arith.extui %0 : i1 to i32
    %c0_i32_0 = arith.constant 0 : i32
    %2 = arith.cmpi ne, %1, %c0_i32_0 : i32
    scf.if %2 {
      %cst_49 = arith.constant 0.000000e+00 : f32
      %101 = vector.broadcast %cst_49 : f32 to vector<1x1x1xf32>
      %c0_50 = arith.constant 0 : index
      %c0_51 = arith.constant 0 : index
      %c0_52 = arith.constant 0 : index
      %102 = vector.load %arg7[%c0_50, %c0_51, %c0_52] : memref<1x1x1xf32, #tpu.memory_space<vmem>>, vector<1x1x1xf32>
      tpu.vector_store %arg7[%c0_50, %c0_51, %c0_52], %101 {strides = array<i32>} : memref<1x1x1xf32, #tpu.memory_space<vmem>>, vector<1x1x1xf32>,
      %cst_53 = arith.constant 0.000000e+00 : f32
      %103 = vector.broadcast %cst_53 : f32 to vector<1x1x1xf32>
      %c0_54 = arith.constant 0 : index
      %c0_55 = arith.constant 0 : index
      %c0_56 = arith.constant 0 : index
      %104 = vector.load %arg8[%c0_54, %c0_55, %c0_56] : memref<1x1x1xf32, #tpu.memory_space<vmem>>, vector<1x1x1xf32>
      tpu.vector_store %arg8[%c0_54, %c0_55, %c0_56], %103 {strides = array<i32>} : memref<1x1x1xf32, #tpu.memory_space<vmem>>, vector<1x1x1xf32>,
      %cst_57 = arith.constant 0.000000e+00 : f32
      %105 = vector.broadcast %cst_57 : f32 to vector<1x1x16xf32>
      %c0_58 = arith.constant 0 : index
      %c0_59 = arith.constant 0 : index
      %c0_60 = arith.constant 0 : index
      %106 = vector.load %arg9[%c0_58, %c0_59, %c0_60] : memref<1x1x16xf32, #tpu.memory_space<vmem>>, vector<1x1x16xf32>
      tpu.vector_store %arg9[%c0_58, %c0_59, %c0_60], %105 {strides = array<i32>} : memref<1x1x16xf32, #tpu.memory_space<vmem>>, vector<1x1x16xf32>,
      %cst_61 = arith.constant 0.000000e+00 : f32
      %107 = vector.broadcast %cst_61 : f32 to vector<1x1x10xf32>
      %c0_62 = arith.constant 0 : index
      %c0_63 = arith.constant 0 : index
      %c0_64 = arith.constant 0 : index
      %108 = vector.load %arg10[%c0_62, %c0_63, %c0_64] : memref<1x1x10xf32, #tpu.memory_space<vmem>>, vector<1x1x10xf32>
      tpu.vector_store %arg10[%c0_62, %c0_63, %c0_64], %107 {strides = array<i32>} : memref<1x1x10xf32, #tpu.memory_space<vmem>>, vector<1x1x10xf32>,
    } else {
    }
    %c0 = arith.constant 0 : index
    %c0_1 = arith.constant 0 : index
    %3 = vector.load %arg2[%c0, %c0_1] : memref<16x16xf32, #tpu.memory_space<vmem>>, vector<16x16xf32>
    %c0_2 = arith.constant 0 : index
    %c0_3 = arith.constant 0 : index
    %4 = vector.load %arg3[%c0_2, %c0_3] : memref<16x1xf32, #tpu.memory_space<vmem>>, vector<16x1xf32>
    %c0_4 = arith.constant 0 : index
    %c0_5 = arith.constant 0 : index
    %5 = vector.load %arg4[%c0_4, %c0_5] : memref<16x1xi32, #tpu.memory_space<vmem>>, vector<16x1xi32>
    %cst = arith.constant 0.000000e+00 : f32
    %6 = vector.broadcast %cst : f32 to vector<16x1xf32>
    %7 = arith.cmpf one, %4, %6 : vector<16x1xf32>
    %8 = arith.extui %7 : vector<16x1xi1> to vector<16x1xi32>
    %9 = arith.sitofp %8 : vector<16x1xi32> to vector<16x1xf32>
    %10 = tpu.iota {dimensions = array<i32: 1>} : vector<16x16xi32>
    %11 = vector.broadcast %5 : vector<16x1xi32> to vector<16x16xi32>
    %12 = arith.cmpi eq, %10, %11 : vector<16x16xi32>
    %13 = arith.extui %12 : vector<16x16xi1> to vector<16x16xi32>
    %14 = arith.sitofp %13 : vector<16x16xi32> to vector<16x16xf32>
    %cst_6 = arith.constant 1.000000e+00 : f32
    %15 = vector.broadcast %cst_6 : f32 to vector<16x1xf32>
    %16 = arith.subf %15, %9 : vector<16x1xf32>
    %cst_7 = arith.constant 1.000000e+09 : f32
    %17 = vector.broadcast %cst_7 : f32 to vector<16x1xf32>
    %18 = arith.mulf %17, %16 : vector<16x1xf32>
    %19 = vector.broadcast %18 : vector<16x1xf32> to vector<16x16xf32>
    %20 = arith.subf %3, %19 : vector<16x16xf32>
    %cst_8 = arith.constant dense<0xFF800000> : vector<16xf32>
    %21 = vector.multi_reduction <maximumf>, %20, %cst_8 [1] : vector<16x16xf32> to vector<16xf32>
    %22 = vector.shape_cast %21 : vector<16xf32> to vector<16x1xf32>
    %23 = vector.broadcast %22 : vector<16x1xf32> to vector<16x16xf32>
    %24 = arith.subf %20, %23 : vector<16x16xf32>
    %25 = math.exp %24 : vector<16x16xf32>
    %cst_9 = arith.constant dense<0.000000e+00> : vector<16xf32>
    %26 = vector.multi_reduction <add>, %25, %cst_9 [1] : vector<16x16xf32> to vector<16xf32>
    %27 = vector.shape_cast %26 : vector<16xf32> to vector<16x1xf32>
    %28 = math.log %27 : vector<16x1xf32>
    %29 = arith.mulf %14, %24 : vector<16x16xf32>
    %cst_10 = arith.constant dense<0.000000e+00> : vector<16xf32>
    %30 = vector.multi_reduction <add>, %29, %cst_10 [1] : vector<16x16xf32> to vector<16xf32>
    %31 = vector.shape_cast %30 : vector<16xf32> to vector<16x1xf32>
    %32 = arith.subf %31, %28 : vector<16x1xf32>
    %33 = math.exp %32 : vector<16x1xf32>
    %cst_11 = arith.constant 0.000000e+00 : f32
    %34 = vector.broadcast %cst_11 : f32 to vector<16x1xf32>
    %35 = arith.subf %34, %4 : vector<16x1xf32>
    %36 = arith.mulf %35, %32 : vector<16x1xf32>
    %37 = arith.subf %33, %4 : vector<16x1xf32>
    %38 = math.absf %37 : vector<16x1xf32>
    %cst_12 = arith.constant 1.000000e+01 : f32
    %39 = vector.broadcast %cst_12 : f32 to vector<16x1xf32>
    %40 = arith.mulf %38, %39 : vector<16x1xf32>
    %41 = math.floor %40 : vector<16x1xf32>
    %c0_i32_13 = arith.constant 0 : i32
    %c9_i32 = arith.constant 9 : i32
    %42 = arith.sitofp %c0_i32_13 : i32 to f32
    %43 = vector.broadcast %42 : f32 to vector<16x1xf32>
    %44 = arith.maximumf %43, %41 : vector<16x1xf32>
    %45 = arith.sitofp %c9_i32 : i32 to f32
    %46 = vector.broadcast %45 : f32 to vector<16x1xf32>
    %47 = arith.minimumf %46, %44 : vector<16x1xf32>
    %48 = arith.fptosi %47 : vector<16x1xf32> to vector<16x1xi32>
    %c0_14 = arith.constant 0 : index
    %c0_15 = arith.constant 0 : index
    %49 = vector.load %arg5[%c0_14, %c0_15] : memref<1x16xf32, #tpu.memory_space<vmem>>, vector<1x16xf32>
    %50 = vector.broadcast %49 : vector<1x16xf32> to vector<16x16xf32>
    %51 = arith.mulf %14, %50 : vector<16x16xf32>
    %cst_16 = arith.constant dense<0.000000e+00> : vector<16xf32>
    %52 = vector.multi_reduction <add>, %51, %cst_16 [1] : vector<16x16xf32> to vector<16xf32>
    %53 = vector.shape_cast %52 : vector<16xf32> to vector<16x1xf32>
    %54 = tpu.iota {dimensions = array<i32: 1>} : vector<16x10xi32>
    %55 = vector.broadcast %48 : vector<16x1xi32> to vector<16x10xi32>
    %56 = arith.cmpi eq, %54, %55 : vector<16x10xi32>
    %57 = arith.extui %56 : vector<16x10xi1> to vector<16x10xi32>
    %58 = arith.sitofp %57 : vector<16x10xi32> to vector<16x10xf32>
    %c0_17 = arith.constant 0 : index
    %c0_18 = arith.constant 0 : index
    %59 = vector.load %arg6[%c0_17, %c0_18] : memref<1x10xf32, #tpu.memory_space<vmem>>, vector<1x10xf32>
    %60 = vector.broadcast %59 : vector<1x10xf32> to vector<16x10xf32>
    %61 = arith.mulf %58, %60 : vector<16x10xf32>
    %cst_19 = arith.constant dense<0.000000e+00> : vector<16xf32>
    %62 = vector.multi_reduction <add>, %61, %cst_19 [1] : vector<16x10xf32> to vector<16xf32>
    %63 = vector.shape_cast %62 : vector<16xf32> to vector<16x1xf32>
    %64 = arith.mulf %53, %63 : vector<16x1xf32>
    %65 = math.rsqrt %64 : vector<16x1xf32>
    %66 = arith.mulf %36, %65 : vector<16x1xf32>
    %67 = arith.mulf %66, %9 : vector<16x1xf32>
    %c0_20 = arith.constant 0 : index
    %c0_21 = arith.constant 0 : index
    %c0_22 = arith.constant 0 : index
    %68 = vector.load %arg7[%c0_20, %c0_21, %c0_22] : memref<1x1x1xf32, #tpu.memory_space<vmem>>, vector<1x1x1xf32>
    %69 = vector.shape_cast %67 : vector<16x1xf32> to vector<1x16x1xf32>
    %cst_23 = arith.constant dense<0.000000e+00> : vector<1xf32>
    %70 = vector.multi_reduction <add>, %69, %cst_23 [1, 2] : vector<1x16x1xf32> to vector<1xf32>
    %71 = vector.shape_cast %70 : vector<1xf32> to vector<1x1x1xf32>
    %72 = vector.extract %71[0, 0, 0] : f32 from vector<1x1x1xf32>
    %73 = vector.broadcast %72 : f32 to vector<1x1xf32>
    %74 = vector.shape_cast %73 : vector<1x1xf32> to vector<1x1x1xf32>
    %75 = arith.addf %68, %74 : vector<1x1x1xf32>
    %c0_24 = arith.constant 0 : index
    %c0_25 = arith.constant 0 : index
    %c0_26 = arith.constant 0 : index
    %76 = vector.load %arg7[%c0_24, %c0_25, %c0_26] : memref<1x1x1xf32, #tpu.memory_space<vmem>>, vector<1x1x1xf32>
    tpu.vector_store %arg7[%c0_24, %c0_25, %c0_26], %75 {strides = array<i32>} : memref<1x1x1xf32, #tpu.memory_space<vmem>>, vector<1x1x1xf32>,
    %c0_27 = arith.constant 0 : index
    %c0_28 = arith.constant 0 : index
    %c0_29 = arith.constant 0 : index
    %77 = vector.load %arg8[%c0_27, %c0_28, %c0_29] : memref<1x1x1xf32, #tpu.memory_space<vmem>>, vector<1x1x1xf32>
    %78 = vector.shape_cast %9 : vector<16x1xf32> to vector<1x16x1xf32>
    %cst_30 = arith.constant dense<0.000000e+00> : vector<1xf32>
    %79 = vector.multi_reduction <add>, %78, %cst_30 [1, 2] : vector<1x16x1xf32> to vector<1xf32>
    %80 = vector.shape_cast %79 : vector<1xf32> to vector<1x1x1xf32>
    %81 = vector.extract %80[0, 0, 0] : f32 from vector<1x1x1xf32>
    %82 = vector.broadcast %81 : f32 to vector<1x1xf32>
    %83 = vector.shape_cast %82 : vector<1x1xf32> to vector<1x1x1xf32>
    %84 = arith.addf %77, %83 : vector<1x1x1xf32>
    %c0_31 = arith.constant 0 : index
    %c0_32 = arith.constant 0 : index
    %c0_33 = arith.constant 0 : index
    %85 = vector.load %arg8[%c0_31, %c0_32, %c0_33] : memref<1x1x1xf32, #tpu.memory_space<vmem>>, vector<1x1x1xf32>
    tpu.vector_store %arg8[%c0_31, %c0_32, %c0_33], %84 {strides = array<i32>} : memref<1x1x1xf32, #tpu.memory_space<vmem>>, vector<1x1x1xf32>,
    %cst_34 = arith.constant 1.000000e+00 : f32
    %86 = vector.broadcast %cst_34 : f32 to vector<1x16xf32>
    %c0_35 = arith.constant 0 : index
    %c0_36 = arith.constant 0 : index
    %c0_37 = arith.constant 0 : index
    %87 = vector.load %arg9[%c0_35, %c0_36, %c0_37] : memref<1x1x16xf32, #tpu.memory_space<vmem>>, vector<1x1x16xf32>
    %88 = vector.broadcast %9 : vector<16x1xf32> to vector<16x16xf32>
    %89 = arith.mulf %14, %88 : vector<16x16xf32>
    %cst_38 = arith.constant dense<0.000000e+00> : vector<1x16xf32>
    %90 = tpu.matmul %86, %89, %cst_38 {dimension_numbers = #tpu.dot_dimension_numbers<[1], [0], [0], [1], [0, 0, 1, 1], [], []>} : vector<1x16xf32>, vector<16x16xf32>, vector<1x16xf32> -> vector<1x16xf32>
    %91 = vector.shape_cast %90 : vector<1x16xf32> to vector<1x1x16xf32>
    %92 = arith.addf %87, %91 : vector<1x1x16xf32>
    %c0_39 = arith.constant 0 : index
    %c0_40 = arith.constant 0 : index
    %c0_41 = arith.constant 0 : index
    %93 = vector.load %arg9[%c0_39, %c0_40, %c0_41] : memref<1x1x16xf32, #tpu.memory_space<vmem>>, vector<1x1x16xf32>
    tpu.vector_store %arg9[%c0_39, %c0_40, %c0_41], %92 {strides = array<i32>} : memref<1x1x16xf32, #tpu.memory_space<vmem>>, vector<1x1x16xf32>,
    %c0_42 = arith.constant 0 : index
    %c0_43 = arith.constant 0 : index
    %c0_44 = arith.constant 0 : index
    %94 = vector.load %arg10[%c0_42, %c0_43, %c0_44] : memref<1x1x10xf32, #tpu.memory_space<vmem>>, vector<1x1x10xf32>
    %95 = vector.broadcast %9 : vector<16x1xf32> to vector<16x10xf32>
    %96 = arith.mulf %58, %95 : vector<16x10xf32>
    %cst_45 = arith.constant dense<0.000000e+00> : vector<1x10xf32>
    %97 = tpu.matmul %86, %96, %cst_45 {dimension_numbers = #tpu.dot_dimension_numbers<[1], [0], [0], [1], [0, 0, 1, 1], [], []>} : vector<1x16xf32>, vector<16x10xf32>, vector<1x10xf32> -> vector<1x10xf32>
    %98 = vector.shape_cast %97 : vector<1x10xf32> to vector<1x1x10xf32>
    %99 = arith.addf %94, %98 : vector<1x1x10xf32>
    %c0_46 = arith.constant 0 : index
    %c0_47 = arith.constant 0 : index
    %c0_48 = arith.constant 0 : index
    %100 = vector.load %arg10[%c0_46, %c0_47, %c0_48] : memref<1x1x10xf32, #tpu.memory_space<vmem>>, vector<1x1x10xf32>
    tpu.vector_store %arg10[%c0_46, %c0_47, %c0_48], %99 {strides = array<i32>} : memref<1x1x10xf32, #tpu.memory_space<vmem>>, vector<1x1x10xf32>,
    return
  }
  func.func @transform_0(%arg0: i32, %arg1: i32) -> (i32, i32) {
    %c1_i32 = arith.constant 1 : i32
    %0 = arith.muli %arg0, %c1_i32 : i32
    %1 = arith.addi %0, %arg1 : i32
    %c0_i32 = arith.constant 0 : i32
    %c0_i32_0 = arith.constant 0 : i32
    return %1, %c0_i32 : i32, i32
  }
  func.func @transform_1(%arg0: i32, %arg1: i32) -> (i32, i32) {
    %c1_i32 = arith.constant 1 : i32
    %0 = arith.muli %arg0, %c1_i32 : i32
    %1 = arith.addi %0, %arg1 : i32
    %c0_i32 = arith.constant 0 : i32
    %c0_i32_0 = arith.constant 0 : i32
    return %1, %c0_i32 : i32, i32
  }
  func.func @transform_2(%arg0: i32, %arg1: i32) -> (i32, i32) {
    %c1_i32 = arith.constant 1 : i32
    %0 = arith.muli %arg0, %c1_i32 : i32
    %1 = arith.addi %0, %arg1 : i32
    %c0_i32 = arith.constant 0 : i32
    %c0_i32_0 = arith.constant 0 : i32
    return %1, %c0_i32 : i32, i32
  }
  func.func @transform_3(%arg0: i32, %arg1: i32) -> (i32, i32) {
    %c0_i32 = arith.constant 0 : i32
    %c0_i32_0 = arith.constant 0 : i32
    %c0_i32_1 = arith.constant 0 : i32
    return %c0_i32, %c0_i32_0 : i32, i32
  }
  func.func @transform_4(%arg0: i32, %arg1: i32) -> (i32, i32) {
    %c0_i32 = arith.constant 0 : i32
    %c0_i32_0 = arith.constant 0 : i32
    %c0_i32_1 = arith.constant 0 : i32
    return %c0_i32, %c0_i32_0 : i32, i32
  }
  func.func @transform_5(%arg0: i32, %arg1: i32) -> (i32, i32, i32) {
    %c0_i32 = arith.constant 0 : i32
    %c0_i32_0 = arith.constant 0 : i32
    %c0_i32_1 = arith.constant 0 : i32
    return %arg0, %c0_i32, %c0_i32_0 : i32, i32, i32
  }
  func.func @transform_6(%arg0: i32, %arg1: i32) -> (i32, i32, i32) {
    %c0_i32 = arith.constant 0 : i32
    %c0_i32_0 = arith.constant 0 : i32
    %c0_i32_1 = arith.constant 0 : i32
    return %arg0, %c0_i32, %c0_i32_0 : i32, i32, i32
  }
  func.func @transform_7(%arg0: i32, %arg1: i32) -> (i32, i32, i32) {
    %c0_i32 = arith.constant 0 : i32
    %c0_i32_0 = arith.constant 0 : i32
    %c0_i32_1 = arith.constant 0 : i32
    return %arg0, %c0_i32, %c0_i32_0 : i32, i32, i32
  }
  func.func @transform_8(%arg0: i32, %arg1: i32) -> (i32, i32, i32) {
    %c0_i32 = arith.constant 0 : i32
    %c0_i32_0 = arith.constant 0 : i32
    %c0_i32_1 = arith.constant 0 : i32
    return %arg0, %c0_i32, %c0_i32_0 : i32, i32, i32
  }
}

</mosaic_0001>

<bundles_post_ra>
// kernel: tpu_custom_call.1
= control target key start
LH: loop header
LB: loop body
LE: loop exit
PB: predicated region body
PF: predicated region fallthrough
CT: control target
= control target key end

     0   :  { %14 = vsyncpa [#allocation3], 0  ;;  %s912_s0 = inlined_call_operand.vmem [shape: f32[16,16], index: 0, kind: input, shape index: {}]   ;;  %s913_s1 = inlined_call_operand.vmem [shape: f32[16,1], index: 1, kind: input, shape index: {}]   ;;  %s914_s2 = inlined_call_operand.vmem [shape: s32[16,1], index: 2, kind: input, shape index: {}]   ;;  %s915_s3 = inlined_call_operand.vmem [shape: f32[1,16], index: 3, kind: input, shape index: {}]   ;;  %s916_s4 = inlined_call_operand.vmem [shape: f32[1,10], index: 4, kind: input, shape index: {}]   ;;  %s917_s5 = inlined_call_operand.hbm [shape: f32[1,1,1], index: 5, kind: output, shape index: {0}]   ;;  %s918_s6 = inlined_call_operand.hbm [shape: f32[1,1,1], index: 6, kind: output, shape index: {1}]   ;;  %s919_s7 = inlined_call_operand.hbm [shape: f32[1,1,16], index: 7, kind: output, shape index: {2}]   ;;  %s920_s8 = inlined_call_operand.hbm [shape: f32[1,1,10], index: 8, kind: output, shape index: {3}]  }
   0x1   :  { %15 = vsyncpa [#allocation5], 0  ;;  %v751_v0 = vld [vmem:[%s913_s1] sm:$0xff]  ;;  %v756_v1 = vld [vmem:[%s913_s1 + $0x8] sm:$0xff]  ;;  %v694_v2 = vmov 0  }
   0x2   :  { %577 = vset.pattern.permute.xlu0 %v694_v2  ;;  %vm110_vm0 = vcmp.ne.f32.partialorder %v751_v0, 0.0  ;;  %vm111_vm1 = vcmp.ne.f32.partialorder %v756_v1, 0.0  ;;  %578 = vset.pattern.permute.xlu1 %v694_v2 }
   0x3   :  { %16 = vsyncpa [#allocation8], 0  ;;  %v695_v3 = vmov 0.0   ;;  %v108_v10 = vld [vmem:[%s914_s2] sm:$0xff]  ;;  %vm146_vm2 = vcmask 130048   ;;  %v105_v14 = vld [vmem:[%s912_s0 + $0x8] sm:$0xff]  ;;  %v116_v23 = vlaneseq }
   0x4   :  { %v761_v4 = vsel %vm110_vm0, 1.0, %v695_v3  ;;  %v764_v5 = vsel %vm111_vm1, 1.0, %v695_v3  ;;  %v104_v11 = vld [vmem:[%s912_s0] sm:$0xff]  ;;  %v109_v19 = vld [vmem:[%s914_s2 + $0x8] sm:$0xff]  ;;  %vm237_vm6 = vcmask 80896   ;;  %vm253_vm8 = vcmask 7168  }
   0x5   :  { %v130_v6 = vsub.f32 1.0, %v761_v4  ;;  %v131_v7 = vsub.f32 1.0, %v764_v5  ;;  %v782_v27 = vand.u32 127, %v116_v23  ;;  %vm697_vm9 = vmmov 0  }
   0x6   :  { %544 = vmatprep.mubr.msk.f32.mxu0 %vm697_vm9, %v695_v3  ;;  %551 = vmatprep.mubr.msk.f32.mxu1 %vm697_vm9, %v695_v3  ;;  %vm97_vm10 = vcmask 0   ;;  %vm100_vm11 = vcmask 122880   ;;  %vm102_vm12 = vcmask 73728  }
   0x7   :  { %v132_v8 = vmul.f32 1e+09, %v130_v6  ;;  %v133_v9 = vmul.f32 1e+09, %v131_v7  ;;  %98 = vst.msk [vmem:[#allocation2] sm:$0x1] %vm97_vm10, %v695_v3 }
   0x8   :  { %99 = vst.msk [vmem:[#allocation4] sm:$0x1] %vm97_vm10, %v695_v3 }
   0x9   :  { %136 = vperm.xlu0 %577, %v132_v8   ;;  %101 = vst.msk [vmem:[#allocation6] sm:$0x1] %vm100_vm11, %v695_v3 }
   0xa   :  { %103 = vst.msk [vmem:[#allocation7] sm:$0x1] %vm102_vm12, %v695_v3 }
   0xd   :  { %141 = vperm.xlu0 %577, %v133_v9   ;;  %v579_v9 = vpack.i.bf16 %v764_v5, %v761_v4 }
  0x11   :  { %119 = vperm.xlu0 %577, %v108_v10  }
  0x88   :  { %v137_v12 = vpop.permute.xlu0 %136 }
  0x89   :  { %v144_v13 = vsub.f32 %v104_v11, %v137_v12  ;;  %v696_v12 = vmov 0.0|0.0  }
  0x8a   :  { %554 = vmatprep.subr.bf16.mxu0 %v696_v12  ;;  %557 = vmatprep.subr.bf16.mxu1 %v696_v12 }
  0x8b   :  { %v147_v15 = vsel %vm146_vm2, %v144_v13, -inf }
  0x8c   :  { %148 = vmax.xlane.f32.xlu1 %v147_v15  ;;  %v142_v16 = vpop.permute.xlu0 %141 }
  0x8d   :  { %v145_v17 = vsub.f32 %v105_v14, %v142_v16 }
  0x8f   :  { %v150_v18 = vsel %vm146_vm2, %v145_v17, -inf }
  0x90   :  { %151 = vmax.xlane.f32.xlu1 %v150_v18  ;;  %v120_v28 = vpop.permute.xlu0 %119 }
  0x91   :  { %vm124_vm3 = vcmp.eq.s32.totalorder %v782_v27, %v120_v28 }
  0x92   :  { %v787_v31 = vsel %vm124_vm3, 1.0, %v695_v3 }
  0xa1   :  { %122 = vperm.xlu1 %578, %v109_v19   ;;  %v531_v19 = vld [vmem:[%s916_s4] ss:$0 sm:$0xff] }
 0x119   :  { %v149_v20 = vpop.xlane.xlu1 %148 }
 0x11a   :  { %v153_v21 = vsub.f32 %v144_v13, %v149_v20  ;;  %v528_v13 = vld [vmem:[%s915_s3] ss:$0 sm:$0xff]  ;;  %s699_s3 = smov [#allocation7]  }
 0x11b   :  { %v208_v14 = vmul.f32 %v528_v13, %v787_v31  ;;  %s487_s4 = sshll.u32 %s699_s3, 4  ;;  %s488_s4 = int_to_ptr.vmem [resolvable:$true] %s487_s4 }
 0x11c   :  { %v155_v22 = vmul.f32 1.442695, %v153_v21  ;;  %v169_v33 = vmul.f32 %v787_v31, %v153_v21  ;;  %s600_s18 = scalar_lea.vmem %s488_s4, 16  ;;  %s604_s19 = scalar_lea.vmem %s488_s4, 32 }
 0x11d   :  { %v152_v24 = vpop.xlane.xlu1 %151  ;;  %v210_v15 = vsel %vm146_vm2, %v208_v14, 0.0  ;;  %p601_p0 = scmp.ne.s32.totalorder %s488_s4, %s600_s18  ;;  %p605_p1 = scmp.lt.s32.totalorder %s488_s4, %s488_s4 }
 0x11e   :  { %584 = vpow2.f32 %v155_v22  ;;  %v154_v25 = vsub.f32 %v145_v17, %v152_v24  ;;  %v171_v37 = vsel %vm146_vm2, %v169_v33, 0.0  ;;  %p606_p2 = scmp.lt.s32.totalorder %s604_s19, %s600_s18 }
 0x120   :  { %v157_v26 = vmul.f32 1.442695, %v154_v25  ;;  %p607_p3 = por %p606_p2, %p605_p1 }
 0x121   :  { %v123_v29 = vpop.permute.xlu1 %122 }
 0x122   :  { %586 = vpow2.f32 %v157_v26  ;;  %vm125_vm4 = vcmp.eq.s32.totalorder %v782_v27, %v123_v29  ;;  %p608_p4 = pnand %p607_p3, %p601_p0 }
 0x123   :  { %v792_v34 = vsel %vm125_vm4, 1.0, %v695_v3 }
 0x124   :  { %v170_v38 = vmul.f32 %v792_v34, %v154_v25  ;;  %v209_v16 = vmul.f32 %v528_v13, %v792_v34 }
 0x126   :  { %v174_v39 = vsel %vm146_vm2, %v170_v38, 0.0  ;;  %v213_v17 = vsel %vm146_vm2, %v209_v16, 0.0 }
 0x128   :  { %v585_v30 = vpop.eup %584 }
 0x129   :  { %v159_v32 = vsel %vm146_vm2, %v585_v30, 0.0 }
 0x12a   :  { %160 = vadd.xlane.f32.xlu0 %v159_v32 }
 0x12c   :  { %v587_v35 = vpop.eup %586 }
 0x12d   :  { %v162_v36 = vsel %vm146_vm2, %v587_v35, 0.0 }
 0x12e   :  { %163 = vadd.xlane.f32.xlu1 %v162_v36  ;;  %172 = vadd.xlane.f32.xlu0 %v171_v37 }
 0x132   :  { %175 = vadd.xlane.f32.xlu0 %v174_v39 }
 0x1b7   :  { %v161_v40 = vpop.xlane.xlu0 %160 }
 0x1b8   :  { %588 = vlog2.f32 %v161_v40 }
 0x1bb   :  { %v164_v41 = vpop.xlane.xlu1 %163  ;;  %v173_v43 = vpop.xlane.xlu0 %172 }
 0x1bc   :  { %590 = vlog2.f32 %v164_v41 }
 0x1bf   :  { %v176_v49 = vpop.xlane.xlu0 %175 }
 0x1c2   :  { %v589_v42 = vpop.eup %588 }
 0x1c3   :  { %v166_v44 = vmul.f32 0.6931472, %v589_v42 }
 0x1c5   :  { %v798_v45 = vsub.f32 %v173_v43, %v166_v44 }
 0x1c6   :  { %v591_v46 = vpop.eup %590 }
 0x1c7   :  { %v179_v47 = vmul.f32 1.442695, %v798_v45  ;;  %v168_v48 = vmul.f32 0.6931472, %v591_v46 }
 0x1c9   :  { %592 = vpow2.f32 %v179_v47  ;;  %v801_v50 = vsub.f32 %v176_v49, %v168_v48  ;;  %v183_v47 = vsub.f32 0.0, %v751_v0  ;;  %v184_v49 = vsub.f32 0.0, %v756_v1 }
 0x1cb   :  { %v181_v51 = vmul.f32 1.442695, %v801_v50  ;;  %v185_v48 = vmul.f32 %v183_v47, %v798_v45 }
 0x1cd   :  { %594 = vpow2.f32 %v181_v51 }
 0x1d3   :  { %v593_v52 = vpop.eup %592 }
 0x1d4   :  { %v187_v53 = vsub.f32 %v593_v52, %v751_v0 }
 0x1d6   :  { %v189_v54 = vand.u32 2147483647, %v187_v53  ;;  %v186_v53 = vmul.f32 %v184_v49, %v801_v50 }
 0x1d7   :  { %v595_v55 = vpop.eup %594 }
 0x1d8   :  { %v191_v56 = vmul.f32 10.0, %v189_v54  ;;  %v188_v57 = vsub.f32 %v595_v55, %v756_v1 }
 0x1da   :  { %v193_v58 = vfloor.f32 %v191_v56  ;;  %v190_v59 = vand.u32 2147483647, %v188_v57 }
 0x1dc   :  { %v195_v60 = vmax.f32 %v193_v58, 0.0  ;;  %v192_v61 = vmul.f32 10.0, %v190_v59 }
 0x1de   :  { %v197_v62 = vmin.f32 %v195_v60, 9.0  ;;  %v194_v63 = vfloor.f32 %v192_v61 }
 0x1e0   :  { %v560_v2 = vtrunc.f32 %v197_v62  ;;  %v196_v6 = vmax.f32 %v194_v63, 0.0 }
 0x1e2   :  { %v561_v7 = vcvt.f32.s32 %v560_v2  ;;  %v198_v8 = vmin.f32 %v196_v6, 9.0 }
 0x1e4   :  { %217 = vperm.xlu0 %577, %v561_v7   ;;  %v562_v10 = vtrunc.f32 %v198_v8 }
 0x1e6   :  { %v563_v11 = vcvt.f32.s32 %v562_v10 }
 0x1e8   :  { %580 = vperm.xlu0 %577, %v579_v9   ;;  %220 = vperm.xlu1 %578, %v563_v11  }
 0x207   :  { %211 = vadd.xlane.f32.xlu0 %v210_v15 }
 0x20c   :  { %214 = vadd.xlane.f32.xlu1 %v213_v17 }
 0x263   :  { %v218_v18 = vpop.permute.xlu0 %217 }
 0x264   :  { %vm222_vm5 = vcmp.eq.s32.totalorder %v782_v27, %v218_v18 }
 0x265   :  { %v529_v20 = vsel %vm222_vm5, 1.0, %v695_v3 }
 0x266   :  { %v235_v21 = vmul.f32 %v531_v19, %v529_v20 }
 0x267   :  { %v221_v22 = vpop.permute.xlu1 %220  ;;  %v581_v23 = vpop.permute.xlu0 %580 }
 0x268   :  { %vm223_vm7 = vcmp.eq.s32.totalorder %v782_v27, %v221_v22  ;;  %v583_v24 = vunpack.i.h.bf16 %v581_v23  ;;  %v582_v25 = vunpack.i.l.bf16 %v581_v23  ;;  %v238_v26 = vsel %vm237_vm6, %v235_v21, 0.0 }
 0x269   :  { %v530_v28 = vsel %vm223_vm7, 1.0, %v695_v3  ;;  %239 = vadd.xlane.f32.xlu0 %v238_v26  ;;  %v271_v27 = vsel %vm253_vm8, %v761_v4, 0.0 }
 0x26a   :  { %v236_v29 = vmul.f32 %v531_v19, %v530_v28  ;;  %v297_v30 = vmul.f32 %v582_v25, %v787_v31  ;;  %v298_v32 = vmul.f32 %v583_v24, %v792_v34  ;;  %v376_v33 = vmul.f32 %v582_v25, %v529_v20 }
 0x26b   :  { %v377_v35 = vmul.f32 %v583_v24, %v530_v28  ;;  %v272_v31 = vsel %vm253_vm8, %v764_v5, 0.0  ;;  %v698_v34 = vmov 1.0  }
 0x26c   :  { %v241_v36 = vsel %vm237_vm6, %v236_v29, 0.0  ;;  %v555_v37 = vpack.c.bf16 %v298_v32, %v297_v30  ;;  %v273_v39 = vadd.f32 %v272_v31, %v271_v27 }
 0x26d   :  { %242 = vadd.xlane.f32.xlu0 %v241_v36  ;;  %v558_v38 = vpack.c.bf16 %v377_v35, %v376_v33 }
 0x26e   :  { %556 = vmatpush3.bf16.msra.mxu0 %v555_v37 }
 0x26f   :  { %559 = vmatpush3.bf16.msra.mxu1 %v558_v38 }
 0x271   :  { %545 = vmatmul.mubr.msk.f32.vlgmr.msra.gmra.mrb[0].mxu0 %vm146_vm2, %v698_v34  ;;  %274 = vadd.xlane.f32.xlu0 %v273_v39 }
 0x272   :  { %552 = vmatmul.mubr.msk.f32.vlgmr.msra.gmra.mrb[0].mxu1 %vm146_vm2, %v698_v34 }
 0x294   :  { %v212_v40 = vpop.xlane.xlu0 %211 }
 0x299   :  { %v215_v43 = vpop.xlane.xlu1 %214 }
 0x2f6   :  { %v240_v41 = vpop.xlane.xlu0 %239 }
 0x2f7   :  { %v244_v42 = vmul.f32 %v240_v41, %v212_v40 }
 0x2f9   :  { %596 = vrsqrt.f32 %v244_v42 }
 0x2fa   :  { %v243_v44 = vpop.xlane.xlu0 %242 }
 0x2fb   :  { %v245_v46 = vmul.f32 %v243_v44, %v215_v43 }
 0x2fd   :  { %598 = vrsqrt.f32 %v245_v46 }
 0x303   :  { %v597_v51 = vpop.eup %596 }
 0x304   :  { %v248_v52 = vmul.f32 %v597_v51, %v185_v48 }
 0x306   :  { %v250_v56 = vmul.f32 %v761_v4, %v248_v52  ;;  %v286_v4 = vld [vmem:[#allocation6] sm:$0x1] }
 0x307   :  { %v599_v54 = vpop.eup %598 }
 0x308   :  { %v249_v55 = vmul.f32 %v599_v54, %v186_v53  ;;  %v254_v58 = vsel %vm253_vm8, %v250_v56, 0.0 }
 0x30a   :  { %v251_v57 = vmul.f32 %v764_v5, %v249_v55  ;;  %v375_v5 = vld [vmem:[#allocation7] sm:$0x1] }
 0x30c   :  { %v255_v59 = vsel %vm253_vm8, %v251_v57, 0.0 }
 0x30d   :  { %v256_v60 = vadd.f32 %v255_v59, %v254_v58 }
 0x30f   :  { %257 = vadd.xlane.f32.xlu1 %v256_v60 }
 0x344   :  { %v368_v0 = vpop.f32.mrb[0].mxu0 }
 0x345   :  { %v444_v1 = vpop.f32.mrb[0].mxu1  ;;  %v546_v45 = vpop.f32.mrb[1].mxu0  ;;  %v372_v61 = vadd.f32 %v368_v0, %v286_v4 }
 0x346   :  { %v553_v50 = vpop.f32.mrb[1].mxu1  ;;  %v448_v62 = vadd.f32 %v444_v1, %v375_v5 }
 0x347   :  { %374 = vst.msk [vmem:[#allocation6] sm:$0x1] %vm100_vm11, %v372_v61 }
 0x348   :  { %450 = vst.msk [vmem:[#allocation7] sm:$0x1] %vm102_vm12, %v448_v62 }
 0x349   :  { %611 = shalt.err (!%p608_p4)
}
 0x34a   :  { %s612_s22 = scalar_lea.hbm %s920_s8, 16 }
 0x34b   :  { %p613_p5 = scmp.ne.s32.totalorder %s920_s8, %s612_s22  ;;  %p616_p6 = scmp.lt.u32.totalorder %s612_s22, %s920_s8 }
 0x34d   :  { %p618_p7 = pnand %p616_p6, %p613_p5 }
 0x34f   :  { %621 = shalt.err (!%p618_p7)
}
 0x350   :  { %490 = dma.vmem_to_hbm [thread:$0]  %s488_s4, 16, %s920_s8, [#allocation8]   ;;  %v275_v3 = vpop.xlane.xlu0 %274  ;;  %v252_v17 = vld [vmem:[#allocation2] sm:$0x1]  ;;  %v270_v18 = vld [vmem:[#allocation4] sm:$0x1] }
 0x351   :  { %v276_v63 = vrot.slane %v275_v3, 4  ;;  %s700_s29 = smov [#allocation2]   ;;  %s701_s1 = smov [#allocation4]  }
 0x352   :  { %s457_s30 = sshll.u32 %s700_s29, 4  ;;  %s467_s9 = sshll.u32 %s701_s1, 4  ;;  %s458_s30 = int_to_ptr.vmem [resolvable:$true] %s457_s30  ;;  %s858_s9 = int_to_ptr.vmem [resolvable:$true] %s467_s9 }
 0x353   :  { %v277_v2 = vadd.f32 %v276_v63, %v275_v3  ;;  %s702_s11 = smov [#allocation6]   ;;  %s622_s13 = scalar_lea.vmem %s458_s30, 16 }
 0x354   :  { %s477_s12 = sshll.u32 %s702_s11, 4  ;;  %p623_p8 = scmp.ne.s32.totalorder %s458_s30, %s622_s13  ;;  %s861_s12 = int_to_ptr.vmem [resolvable:$true] %s477_s12 }
 0x355   :  { %v278_v6 = vrot.slane %v277_v2, 2  ;;  %s626_s14 = scalar_lea.vmem %s458_s30, 32  ;;  %p627_p9 = scmp.lt.s32.totalorder %s458_s30, %s458_s30 }
 0x356   :  { %p628_p10 = scmp.lt.s32.totalorder %s626_s14, %s622_s13 }
 0x357   :  { %v279_v10 = vadd.f32 %v278_v6, %v277_v2 }
 0x358   :  { %p629_p11 = por %p628_p10, %p627_p9 }
 0x359   :  { %v280_v13 = vrot.slane %v279_v10, 1 }
 0x35a   :  { %p630_p12 = pnand %p629_p11, %p623_p8 }
 0x35b   :  { %v281_v16 = vadd.f32 %v280_v13, %v279_v10 }
 0x39c   :  { %v258_v7 = vpop.xlane.xlu1 %257 }
 0x39d   :  { %v259_v8 = vrot.slane %v258_v7, 4 }
 0x39f   :  { %v260_v9 = vadd.f32 %v259_v8, %v258_v7 }
 0x3a1   :  { %v261_v11 = vrot.slane %v260_v9, 2 }
 0x3a3   :  { %v262_v12 = vadd.f32 %v261_v11, %v260_v9 }
 0x3a5   :  { %v263_v14 = vrot.slane %v262_v12, 1 }
 0x3a7   :  { %v264_v15 = vadd.f32 %v263_v14, %v262_v12 }
 0x3a9   :  { %564 = vpush %v264_v15 }
 0x3aa   :  { %566 = vpush %v281_v16 }
 0x3da   :  { %s565_s8 = spop %564 }
 0x3db   :  { %v266_v19 = vstv %s565_s8  ;;  %s567_s10 = spop %566 }
 0x3dc   :  { %v267_v20 = vadd.f32 %v266_v19, %v252_v17  ;;  %v283_v21 = vstv %s567_s10 }
 0x3dd   :  { %v284_v22 = vadd.f32 %v283_v21, %v270_v18 }
 0x3de   :  { %269 = vst.msk [vmem:[#allocation2] sm:$0x1] %vm97_vm10, %v267_v20 }
 0x3df   :  { %285 = vst.msk [vmem:[#allocation4] sm:$0x1] %vm97_vm10, %v284_v22 }
 0x3e0   :  { %633 = shalt.err (!%p630_p12)
}
 0x3e1   :  { %s634_s2 = scalar_lea.hbm %s917_s5, 16 }
 0x3e2   :  { %p635_p13 = scmp.ne.s32.totalorder %s917_s5, %s634_s2  ;;  %p638_p0 = scmp.lt.u32.totalorder %s634_s2, %s917_s5 }
 0x3e4   :  { %p640_p1 = pnand %p638_p0, %p635_p13 }
 0x3e6   :  { %643 = shalt.err (!%p640_p1)
}
 0x3e7   :  { %460 = dma.vmem_to_hbm [thread:$0]  %s458_s30, 16, %s917_s5, [#allocation3]  }
 0x3e8   :  { %s644_s20 = scalar_lea.vmem %s858_s9, 16  ;;  %s648_s21 = scalar_lea.vmem %s858_s9, 32 }
 0x3e9   :  { %p645_p2 = scmp.ne.s32.totalorder %s858_s9, %s644_s20  ;;  %p649_p3 = scmp.lt.s32.totalorder %s858_s9, %s858_s9 }
 0x3ea   :  { %p650_p4 = scmp.lt.s32.totalorder %s648_s21, %s644_s20 }
 0x3ec   :  { %p651_p5 = por %p650_p4, %p649_p3 }
 0x3ee   :  { %p652_p6 = pnand %p651_p5, %p645_p2 }
 0x3f0   :  { %655 = shalt.err (!%p652_p6)
}
 0x3f1   :  { %s656_s24 = scalar_lea.hbm %s918_s6, 16 }
 0x3f2   :  { %p657_p7 = scmp.ne.s32.totalorder %s918_s6, %s656_s24  ;;  %p660_p8 = scmp.lt.u32.totalorder %s656_s24, %s918_s6 }
 0x3f4   :  { %p662_p9 = pnand %p660_p8, %p657_p7 }
 0x3f6   :  { %665 = shalt.err (!%p662_p9)
}
 0x3f7   :  { %470 = dma.vmem_to_hbm [thread:$0]  %s858_s9, 16, %s918_s6, [#allocation5]  }
 0x3f8   :  { %s666_s30 = scalar_lea.vmem %s861_s12, 16  ;;  %s670_s8 = scalar_lea.vmem %s861_s12, 32 }
 0x3f9   :  { %p667_p10 = scmp.ne.s32.totalorder %s861_s12, %s666_s30  ;;  %p671_p11 = scmp.lt.s32.totalorder %s861_s12, %s861_s12 }
 0x3fa   :  { %p672_p12 = scmp.lt.s32.totalorder %s670_s8, %s666_s30 }
 0x3fc   :  { %p673_p13 = por %p672_p12, %p671_p11 }
 0x3fe   :  { %p674_p0 = pnand %p673_p13, %p667_p10 }
 0x400   :  { %677 = shalt.err (!%p674_p0)
}
 0x401   :  { %s678_s11 = scalar_lea.hbm %s919_s7, 16 }
 0x402   :  { %p679_p1 = scmp.ne.s32.totalorder %s919_s7, %s678_s11  ;;  %p682_p2 = scmp.lt.u32.totalorder %s678_s11, %s919_s7 }
 0x404   :  { %p684_p3 = pnand %p682_p2, %p679_p1 }
 0x406   :  { %687 = shalt.err (!%p684_p3)
}
 0x407   :  { %480 = dma.vmem_to_hbm [thread:$0]  %s861_s12, 16, %s919_s7, [#allocation5]  }
 0x408   :  { %688 = dma.done.wait [#allocation3], 16  }
 0x409   :  { %689 = vsyncadd [#allocation3], 4294967280 }
 0x40a   :  { %690 = dma.done.wait [#allocation5], 32  }
 0x40b   :  { %691 = vsyncadd [#allocation5], 4294967264 }
 0x40c   :  { %692 = dma.done.wait [#allocation8], 16  }
 0x40d   :  { %693 = vsyncadd [#allocation8], 4294967280 }
 0x40e   :  { %503 = vsyncpa [#allocation3], 1 }
 0x40f   :  { %504 = vsyncpa [#allocation5], 1 }
 0x410   :  { %505 = vsyncpa [#allocation8], 1 }

</bundles_post_ra>
